<compile_context>
chip_gen: v6e
topology: v6e:2x2x1
jax: 0.10.0
libtpu: 0.0.40
codegen_flags: <defaults>
</compile_context>

<pallas_src>
import jax
import jax.numpy as jnp
from jax.experimental import pallas as pl
from jax.experimental.pallas import tpu as pltpu


_TILE_B_MAX = 32768  # keeps the full VMEM plan well under v7x's 64 MiB per-TC


def _mlp_kernel(x_ref, w1_ref, b1_ref, w2_ref, b2_ref, w3_ref, b3_ref, o_ref):
    # Feature-major compute: x block is (F, TILE_B); activations are
    # (features, TILE_B) so the batch stays on the 128-wide lane axis and the
    # tiny PyTorch-layout (out, in) weight matrices are the stationary MXU
    # operand.  No relayout of the streamed x tile is needed.
    x = x_ref[...]                                                 # (37, TILE_B)

    # layer 1: (20, 37) @ (37, TILE_B) -> (20, TILE_B), f32 accumulation
    h1 = jnp.dot(w1_ref[...], x, preferred_element_type=jnp.float32) + b1_ref[...]
    h1 = jnp.maximum(h1, 0.0)

    # layer 2: (10, 20) @ (20, TILE_B) -> (10, TILE_B)
    h2 = jnp.dot(w2_ref[...], h1, preferred_element_type=jnp.float32) + b2_ref[...]
    h2 = jnp.maximum(h2, 0.0)

    # output: (1, 10) @ (10, TILE_B) -> (1, TILE_B), lane-dense store
    logits = jnp.dot(w3_ref[...], h2, preferred_element_type=jnp.float32) + b3_ref[...]
    o_ref[...] = jax.nn.sigmoid(logits).astype(o_ref.dtype)


def _round_up(n, m):
    return -(-n // m) * m


def _choose_tile_b(B, tile_b):
    """128-aligned batch tile; >=2 grid steps on large batches (v7x megacore)."""
    tile_b = max(1, min(int(tile_b), _TILE_B_MAX, B))
    if B >= 256:
        # Keep at least 2 grid steps so ("parallel",) splits across both TCs.
        tile_b = min(tile_b, _round_up(_round_up(B, 2) // 2, 128))
    if tile_b < B:
        # Multi-step grid: the (1, tile_b) output / (F, tile_b) input blocks
        # need a lane-aligned (multiple-of-128) minor dimension.
        tile_b = max(128, (tile_b // 128) * 128)
        tile_b = min(tile_b, B)
    return tile_b


def _vmem_limit_bytes(F, tile_b):
    """Scoped-VMEM budget from the padded block footprints (+ headroom)."""
    pad8 = lambda n: _round_up(n, 8)
    pad128 = lambda n: _round_up(n, 128)
    x_bytes = pad8(F) * pad128(tile_b) * 4 * 2        # streamed x, double-buffered
    o_bytes = pad8(1) * pad128(tile_b) * 4 * 2        # streamed output
    w_bytes = 0
    for r, c in ((20, F), (20, 1), (10, 20), (10, 1), (1, 10), (1, 1)):
        w_bytes += pad8(r) * pad128(c) * 4 * 2        # resident weights/biases
    return int((x_bytes + o_bytes + w_bytes) * 1.5) + (4 << 20)


def nn2hidden_forward_fm(x_fm, params, *, tile_b=8192, stream_dtype=jnp.float32):
    """Feature-major entry point.  x_fm: (input_size, B).  Returns (1, B) f32."""
    w1, b1, w2, b2, w3, b3 = params
    F, B = x_fm.shape
    tile_b = _choose_tile_b(B, tile_b)
    grid = (pl.cdiv(B, tile_b),)

    if stream_dtype != x_fm.dtype:
        # Halve the dominant HBM stream; MXU still accumulates in f32 and the
        # bias/ReLU/sigmoid path stays f32.
        x_fm = x_fm.astype(stream_dtype)
        w1 = w1.astype(stream_dtype)

    def resident(a):
        # Full-shape block, constant index_map -> fetched once, VMEM-resident.
        return pl.BlockSpec(a.shape, lambda i: (0, 0))

    out = pl.pallas_call(
        _mlp_kernel,
        out_shape=jax.ShapeDtypeStruct((1, B), jnp.float32),
        grid=grid,
        in_specs=[
            pl.BlockSpec((F, tile_b), lambda i: (0, i)),       # streamed x tile
            resident(w1), resident(b1),
            resident(w2), resident(b2),
            resident(w3), resident(b3),
        ],
        out_specs=pl.BlockSpec((1, tile_b), lambda i: (0, i)),  # lane-dense output
        compiler_params=pltpu.CompilerParams(
            dimension_semantics=("parallel",),                  # 2 TCs on v7x
            vmem_limit_bytes=_vmem_limit_bytes(F, tile_b),
        ),
    )(x_fm, w1, b1, w2, b2, w3, b3)
    return out


def nn2hidden_forward(x, params, *, tile_b=8192, stream_dtype=jnp.float32):
    """PyTorch-layout entry point.  x: (B, input_size) f32.  Returns (B, 1) f32.

    NOTE: the kernel consumes x feature-major; this wrapper pays one extra
    transpose pass over x.  Producers that can emit (input_size, B) directly
    should call nn2hidden_forward_fm() and avoid it.
    """
    B = x.shape[0]
    out = nn2hidden_forward_fm(x.T, params, tile_b=tile_b, stream_dtype=stream_dtype)
    # (1, B) -> (B, 1): identical row-major layout, free reshape.
    return out.reshape(B, 1)


def init_params(key, input_size=37):
    """PyTorch-Linear-style init U(-1/sqrt(fan_in), +1/sqrt(fan_in)).

    Weights stored in PyTorch (out_features, in_features) layout; biases as
    (out_features, 1) so they broadcast over the lane (batch) axis in-kernel.
    """
    def linear_init(k, fan_in, fan_out):
        kw, kb = jax.random.split(k)
        bound = 1.0 / jnp.sqrt(float(fan_in))
        w = jax.random.uniform(kw, (fan_out, fan_in), jnp.float32, -bound, bound)
        b = jax.random.uniform(kb, (fan_out, 1), jnp.float32, -bound, bound)
        return w, b

    k1, k2, k3 = jax.random.split(key, 3)
    w1, b1 = linear_init(k1, input_size, 20)
    w2, b2 = linear_init(k2, 20, 10)
    w3, b3 = linear_init(k3, 10, 1)
    return (w1, b1, w2, b2, w3, b3)


def reference_forward(x, params):
    """Pure-JAX reference of the same forward pass (sanity check)."""
    w1, b1, w2, b2, w3, b3 = params
    h1 = jnp.maximum(x @ w1.T + b1.T, 0.0)
    h2 = jnp.maximum(h1 @ w2.T + b2.T, 0.0)
    return jax.nn.sigmoid(h2 @ w3.T + b3.T)


if __name__ == "__main__":
    key = jax.random.PRNGKey(0)
    k_x, k_p, k_x2 = jax.random.split(key, 3)

    input_size = 37
    params = init_params(k_p, input_size=input_size)

    # Small demo batch (single grid step, full-array blocks).
    x_small = jax.random.normal(k_x, (8, input_size), dtype=jnp.float32)
    out_small = jax.block_until_ready(nn2hidden_forward(x_small, params))
    ref_small = reference_forward(x_small, params)
    assert out_small.shape == (8, 1)
    assert jnp.allclose(out_small, ref_small, atol=1e-5, rtol=1e-5)

    # Exercise the batch grid (multiple 128-aligned tiles + ragged last tile).
    x_grid = jax.random.normal(k_x2, (320, input_size), dtype=jnp.float32)
    out_grid = jax.block_until_ready(nn2hidden_forward(x_grid, params, tile_b=128))
    ref_grid = reference_forward(x_grid, params)
    assert out_grid.shape == (320, 1)
    assert jnp.allclose(out_grid, ref_grid, atol=1e-5, rtol=1e-5)

    # Optional bf16 streaming path (f32 accumulation), checked loosely.
    out_bf16 = jax.block_until_ready(
        nn2hidden_forward(x_grid, params, tile_b=128, stream_dtype=jnp.bfloat16))
    assert out_bf16.shape == (320, 1)
    assert jnp.allclose(out_bf16, ref_grid, atol=3e-2)

    # Feature-major entry point (what a feature-major producer would call).
    out_fm = jax.block_until_ready(nn2hidden_forward_fm(x_grid.T, params, tile_b=128))
    assert out_fm.shape == (1, 320)
    assert jnp.allclose(out_fm.reshape(320, 1), ref_grid, atol=1e-5, rtol=1e-5)

    print("KERNEL_OK")
</pallas_src>

<mosaic_0001>
module attributes {stable_mosaic.version = 11 : i64} {
  func.func @_mlp_kernel(%arg0: i32, %arg1: memref<37x8xf32, #tpu.memory_space<vmem>>, %arg2: memref<20x37xf32, #tpu.memory_space<vmem>>, %arg3: memref<20x1xf32, #tpu.memory_space<vmem>>, %arg4: memref<10x20xf32, #tpu.memory_space<vmem>>, %arg5: memref<10x1xf32, #tpu.memory_space<vmem>>, %arg6: memref<1x10xf32, #tpu.memory_space<vmem>>, %arg7: memref<1x1xf32, #tpu.memory_space<vmem>>, %arg8: memref<1x8xf32, #tpu.memory_space<vmem>>) attributes {dimension_semantics = [#tpu.dimension_semantics<parallel>], iteration_bounds = array<i64: 1>, scalar_prefetch = 0 : i64, scratch_operands = 0 : i64, tpu.core_type = #tpu.core_type<tc>, window_params = [{transform_indices = @transform_0, window_bounds = array<i64: 37, 8>}, {pipeline_mode = #tpu.pipeline_mode<synchronous>, transform_indices = @transform_1, window_bounds = array<i64: 20, 37>}, {pipeline_mode = #tpu.pipeline_mode<synchronous>, transform_indices = @transform_2, window_bounds = array<i64: 20, 1>}, {pipeline_mode = #tpu.pipeline_mode<synchronous>, transform_indices = @transform_3, window_bounds = array<i64: 10, 20>}, {pipeline_mode = #tpu.pipeline_mode<synchronous>, transform_indices = @transform_4, window_bounds = array<i64: 10, 1>}, {pipeline_mode = #tpu.pipeline_mode<synchronous>, transform_indices = @transform_5, window_bounds = array<i64: 1, 10>}, {pipeline_mode = #tpu.pipeline_mode<synchronous>, transform_indices = @transform_6, window_bounds = array<i64: 1, 1>}, {transform_indices = @transform_7, window_bounds = array<i64: 1, 8>}]} {
    %c0 = arith.constant 0 : index
    %c0_0 = arith.constant 0 : index
    %0 = vector.load %arg1[%c0, %c0_0] : memref<37x8xf32, #tpu.memory_space<vmem>>, vector<37x8xf32>
    %c0_1 = arith.constant 0 : index
    %c0_2 = arith.constant 0 : index
    %1 = vector.load %arg2[%c0_1, %c0_2] : memref<20x37xf32, #tpu.memory_space<vmem>>, vector<20x37xf32>
    %cst = arith.constant dense<0.000000e+00> : vector<20x8xf32>
    %2 = tpu.matmul %1, %0, %cst {dimension_numbers = #tpu.dot_dimension_numbers<[1], [0], [0], [1], [0, 0, 1, 1], [], []>} : vector<20x37xf32>, vector<37x8xf32>, vector<20x8xf32> -> vector<20x8xf32>
    %c0_3 = arith.constant 0 : index
    %c0_4 = arith.constant 0 : index
    %3 = vector.load %arg3[%c0_3, %c0_4] : memref<20x1xf32, #tpu.memory_space<vmem>>, vector<20x1xf32>
    %4 = vector.broadcast %3 : vector<20x1xf32> to vector<20x8xf32>
    %5 = arith.addf %2, %4 : vector<20x8xf32>
    %cst_5 = arith.constant 0.000000e+00 : f32
    %6 = vector.broadcast %cst_5 : f32 to vector<20x8xf32>
    %7 = arith.maximumf %5, %6 : vector<20x8xf32>
    %c0_6 = arith.constant 0 : index
    %c0_7 = arith.constant 0 : index
    %8 = vector.load %arg4[%c0_6, %c0_7] : memref<10x20xf32, #tpu.memory_space<vmem>>, vector<10x20xf32>
    %cst_8 = arith.constant dense<0.000000e+00> : vector<10x8xf32>
    %9 = tpu.matmul %8, %7, %cst_8 {dimension_numbers = #tpu.dot_dimension_numbers<[1], [0], [0], [1], [0, 0, 1, 1], [], []>} : vector<10x20xf32>, vector<20x8xf32>, vector<10x8xf32> -> vector<10x8xf32>
    %c0_9 = arith.constant 0 : index
    %c0_10 = arith.constant 0 : index
    %10 = vector.load %arg5[%c0_9, %c0_10] : memref<10x1xf32, #tpu.memory_space<vmem>>, vector<10x1xf32>
    %11 = vector.broadcast %10 : vector<10x1xf32> to vector<10x8xf32>
    %12 = arith.addf %9, %11 : vector<10x8xf32>
    %cst_11 = arith.constant 0.000000e+00 : f32
    %13 = vector.broadcast %cst_11 : f32 to vector<10x8xf32>
    %14 = arith.maximumf %12, %13 : vector<10x8xf32>
    %c0_12 = arith.constant 0 : index
    %c0_13 = arith.constant 0 : index
    %15 = vector.load %arg6[%c0_12, %c0_13] : memref<1x10xf32, #tpu.memory_space<vmem>>, vector<1x10xf32>
    %cst_14 = arith.constant dense<0.000000e+00> : vector<1x8xf32>
    %16 = tpu.matmul %15, %14, %cst_14 {dimension_numbers = #tpu.dot_dimension_numbers<[1], [0], [0], [1], [0, 0, 1, 1], [], []>} : vector<1x10xf32>, vector<10x8xf32>, vector<1x8xf32> -> vector<1x8xf32>
    %c0_15 = arith.constant 0 : index
    %c0_16 = arith.constant 0 : index
    %17 = vector.load %arg7[%c0_15, %c0_16] : memref<1x1xf32, #tpu.memory_space<vmem>>, vector<1x1xf32>
    %18 = vector.broadcast %17 : vector<1x1xf32> to vector<1x8xf32>
    %19 = arith.addf %16, %18 : vector<1x8xf32>
    %20 = arith.negf %19 : vector<1x8xf32>
    %21 = math.exp %20 : vector<1x8xf32>
    %cst_17 = arith.constant 1.000000e+00 : f32
    %22 = vector.broadcast %cst_17 : f32 to vector<1x8xf32>
    %23 = arith.addf %22, %21 : vector<1x8xf32>
    %24 = arith.divf %22, %23 : vector<1x8xf32>
    %c0_18 = arith.constant 0 : index
    %c0_19 = arith.constant 0 : index
    %25 = vector.load %arg8[%c0_18, %c0_19] : memref<1x8xf32, #tpu.memory_space<vmem>>, vector<1x8xf32>
    tpu.vector_store %arg8[%c0_18, %c0_19], %24 {strides = array<i32>} : memref<1x8xf32, #tpu.memory_space<vmem>>, vector<1x8xf32>,
    return
  }
  func.func @transform_0(%arg0: i32) -> (i32, i32) {
    %c0_i32 = arith.constant 0 : i32
    %c0_i32_0 = arith.constant 0 : i32
    return %c0_i32, %arg0 : i32, i32
  }
  func.func @transform_1(%arg0: i32) -> (i32, i32) {
    %c0_i32 = arith.constant 0 : i32
    %c0_i32_0 = arith.constant 0 : i32
    %c0_i32_1 = arith.constant 0 : i32
    return %c0_i32, %c0_i32_0 : i32, i32
  }
  func.func @transform_2(%arg0: i32) -> (i32, i32) {
    %c0_i32 = arith.constant 0 : i32
    %c0_i32_0 = arith.constant 0 : i32
    %c0_i32_1 = arith.constant 0 : i32
    return %c0_i32, %c0_i32_0 : i32, i32
  }
  func.func @transform_3(%arg0: i32) -> (i32, i32) {
    %c0_i32 = arith.constant 0 : i32
    %c0_i32_0 = arith.constant 0 : i32
    %c0_i32_1 = arith.constant 0 : i32
    return %c0_i32, %c0_i32_0 : i32, i32
  }
  func.func @transform_4(%arg0: i32) -> (i32, i32) {
    %c0_i32 = arith.constant 0 : i32
    %c0_i32_0 = arith.constant 0 : i32
    %c0_i32_1 = arith.constant 0 : i32
    return %c0_i32, %c0_i32_0 : i32, i32
  }
  func.func @transform_5(%arg0: i32) -> (i32, i32) {
    %c0_i32 = arith.constant 0 : i32
    %c0_i32_0 = arith.constant 0 : i32
    %c0_i32_1 = arith.constant 0 : i32
    return %c0_i32, %c0_i32_0 : i32, i32
  }
  func.func @transform_6(%arg0: i32) -> (i32, i32) {
    %c0_i32 = arith.constant 0 : i32
    %c0_i32_0 = arith.constant 0 : i32
    %c0_i32_1 = arith.constant 0 : i32
    return %c0_i32, %c0_i32_0 : i32, i32
  }
  func.func @transform_7(%arg0: i32) -> (i32, i32) {
    %c0_i32 = arith.constant 0 : i32
    %c0_i32_0 = arith.constant 0 : i32
    return %c0_i32, %arg0 : i32, i32
  }
}

</mosaic_0001>

<bundles_post_ra>
// kernel: tpu_custom_call.1
= control target key start
LH: loop header
LB: loop body
LE: loop exit
PB: predicated region body
PF: predicated region fallthrough
CT: control target
= control target key end

     0   :  { %s573_s0 = inlined_call_operand.vmem [shape: f32[37,8], index: 0, kind: input, shape index: {}]   ;;  %s574_s1 = inlined_call_operand.vmem [shape: f32[20,37], index: 1, kind: input, shape index: {}]   ;;  %s575_s2 = inlined_call_operand.vmem [shape: f32[20,1], index: 2, kind: input, shape index: {}]   ;;  %s576_s3 = inlined_call_operand.vmem [shape: f32[10,20], index: 3, kind: input, shape index: {}]   ;;  %s577_s4 = inlined_call_operand.vmem [shape: f32[10,1], index: 4, kind: input, shape index: {}]   ;;  %s578_s5 = inlined_call_operand.vmem [shape: f32[1,10], index: 5, kind: input, shape index: {}]   ;;  %s579_s6 = inlined_call_operand.<no memory space> [shape: f32[1,1], index: 6, kind: input, shape index: {}]   ;;  %s580_s7 = inlined_call_operand.hbm [shape: f32[1,8], index: 7, kind: output, shape index: {}]  }
   0x1   :  { %v12_v0 = vstv %s579_s6 }
   0x2   :  { %13 = vst [vmem:[#allocation2] sm:$0x1] %v12_v0 }
   0x3   :  { %v33_v1 = vld [vmem:[%s573_s0 + $0x20] sm:$0x1f]  ;;  %vm65_vm0 = vcmask 1044480   ;;  %v458_v2 = vmov 0.0   ;;  %v32_v3 = vld [vmem:[%s573_s0 + $0x18] sm:$0xff]  ;;  %vm459_vm1 = vmmov 0  }
   0x4   :  { %391 = vmatprep.subr.mxu0 %v458_v2  ;;  %401 = vmatprep.mubr.msk.f32.mxu0 %vm459_vm1, %v458_v2  ;;  %v39_v4 = vld [vmem:[%s575_s2 + $0x10] sm:$0xf]  ;;  %v460_v6 = vmov 0   ;;  %v37_v7 = vld [vmem:[%s575_s2] sm:$0xff] }
   0x5   :  { %392 = vmatpush3.msk.msra.mxu0 %vm65_vm0, %v33_v1  ;;  %v31_v5 = vld [vmem:[%s573_s0 + $0x10] sm:$0xff]  ;;  %430 = vset.pattern.permute.xlu0 %v460_v6 }
   0x6   :  { %393 = vmatprep.subr.mxu0 %v458_v2  ;;  %52 = vperm.xlu0 %430, %v39_v4  }
   0x7   :  { %394 = vmatpush3.msra.mxu0 %v32_v3 }
   0x8   :  { %14 = vsyncpa [#allocation4], 0  ;;  %395 = vmatprep.subr.mxu0 %v458_v2  ;;  %v30_v8 = vld [vmem:[%s573_s0 + $0x8] sm:$0xff]  ;;  %431 = vset.pattern.permute.xlu1 %v460_v6  ;;  %v29_v10 = vld [vmem:[%s573_s0] sm:$0xff]  ;;  %vm55_vm2 = vcmask 302080   ;;  %vm166_vm3 = vcmask 162816   ;;  %v261_v43 = vlaneseq }
   0x9   :  { %v38_v9 = vld [vmem:[%s575_s2 + $0x8] sm:$0xff]  ;;  %396 = vmatpush3.msra.mxu0 %v31_v5  ;;  %42 = vperm.xlu1 %431, %v37_v7   ;;  %v34_v12 = vld [vmem:[%s574_s1] sm:$0xff]  ;;  %v36_v16 = vld [vmem:[%s574_s1 + $0x10] sm:$0xf]  ;;  %vm173_vm4 = vcmask 1043456   ;;  %vm269_vm5 = vcmask 1041408  }
   0xa   :  { %397 = vmatprep.subr.mxu0 %v458_v2  ;;  %v155_v11 = vld [vmem:[%s577_s4 + $0x8] sm:$0x3]  ;;  %47 = vperm.xlu0 %430, %v38_v9   ;;  %v154_v13 = vld [vmem:[%s577_s4] sm:$0xff]  ;;  %vm265_vm6 = vcmask 80896   ;;  %v262_v44 = vshrl.u32 %v261_v43, 7  ;;  %s461_s29 = smov [#allocation3]  }
   0xb   :  { %398 = vmatpush3.msra.mxu0 %v30_v8  ;;  %v255_v14 = vld [vmem:[#allocation2] sm:$0x1]  ;;  %v35_v15 = vld [vmem:[%s574_s1 + $0x8] sm:$0xff]  ;;  %vm349_vm7 = vcmask 57344  }
   0xc   :  { %399 = vmatprep.subr.mxu0 %v458_v2  ;;  %v152_v17 = vld [vmem:[%s576_s3] sm:$0xff]  ;;  %v153_v33 = vld [vmem:[%s576_s3 + $0x8] sm:$0x3]  ;;  %v263_v45 = vsub.s32 0, %v262_v44 }
   0xd   :  { %400 = vmatpush3.msra.mxu0 %v29_v10  ;;  %163 = vperm.xlu1 %431, %v155_v11   ;;  %v254_v42 = vld [vmem:[%s578_s5] sm:$0x1]  ;;  %s357_s5 = sshll.u32 %s461_s29, 4  ;;  %s358_s5 = int_to_ptr.vmem [resolvable:$true] %s357_s5 }
   0xe   :  { %402 = vmatmul.mubr.msk.f32.vlgmr.msra.gmra.mxu0 %vm55_vm2, %v34_v12  ;;  %158 = vperm.xlu0 %430, %v154_v13   ;;  %s436_s30 = scalar_lea.vmem %s358_s5, 16  ;;  %s440_s6 = scalar_lea.vmem %s358_s5, 32 }
   0xf   :  { %404 = vmatprep.mubr.msk.f32.mxu0 %vm459_vm1, %v458_v2  ;;  %416 = vmatprep.mubr.msk.f32.mxu1 %vm166_vm3, %v152_v17  ;;  %p437_p0 = scmp.ne.s32.totalorder %s358_s5, %s436_s30  ;;  %p441_p1 = scmp.lt.s32.totalorder %s358_s5, %s358_s5 }
  0x10   :  { %p442_p2 = scmp.lt.s32.totalorder %s440_s6, %s436_s30 }
  0x11   :  { %258 = vperm.xlu1 %431, %v255_v14  }
  0x12   :  { %405 = vmatmul.mubr.msk.f32.gmra.mxu0 %vm55_vm2, %v35_v15  ;;  %p443_p3 = por %p442_p2, %p441_p1 }
  0x13   :  { %407 = vmatprep.mubr.msk.f32.mxu0 %vm459_vm1, %v458_v2 }
  0x14   :  { %p444_p4 = pnand %p443_p3, %p437_p0 }
  0x16   :  { %408 = vmatmul.mubr.msk.f32.gmra.mxu0 %vm55_vm2, %v36_v16 }
  0x81   :  { %v53_v19 = vpop.permute.xlu0 %52 }
  0x84   :  { %v43_v23 = vpop.permute.xlu1 %42 }
  0x85   :  { %v48_v24 = vpop.permute.xlu0 %47 }
  0x88   :  { %v164_v34 = vpop.permute.xlu1 %163 }
  0x89   :  { %v159_v37 = vpop.permute.xlu0 %158 }
  0x8c   :  { %v259_v46 = vpop.permute.xlu1 %258 }
  0x8d   :  { %v264_v47 = vrot.slane %v259_v46, %v263_v45 }
  0xce   :  { %v135_v18 = vpop.f32.mrf.mxu0 }
  0xcf   :  { %v136_v29 = vadd.f32 %v135_v18, %v43_v23 }
  0xd0   :  { %v403_v20 = vpop.f32.mrf.mxu0 }
  0xd1   :  { %v149_v32 = vmax.f32 %v136_v29, 0.0 }
  0xd2   :  { %v140_v21 = vpop.f32.mrf.mxu0 }
  0xd3   :  { %v141_v26 = vadd.f32 %v140_v21, %v48_v24 }
  0xd4   :  { %v406_v22 = vpop.f32.mrf.mxu0 }
  0xd5   :  { %v150_v31 = vmax.f32 %v141_v26, 0.0 }
  0xd6   :  { %v145_v25 = vpop.f32.mrf.mxu0 }
  0xd7   :  { %v146_v27 = vadd.f32 %v145_v25, %v53_v19 }
  0xd8   :  { %v409_v28 = vpop.f32.mrf.mxu0 }
  0xd9   :  { %v151_v30 = vmax.f32 %v146_v27, 0.0 }
  0xdb   :  { %410 = vmatprep.subr.msk.mxu1 %vm173_vm4, %v151_v30 }
  0xdc   :  { %411 = vmatpush3.msk.msra.mxu1 %vm173_vm4, %v151_v30 }
  0xdd   :  { %412 = vmatprep.subr.mxu1 %v150_v31 }
  0xde   :  { %413 = vmatpush3.msra.mxu1 %v150_v31 }
  0xdf   :  { %414 = vmatprep.subr.mxu1 %v149_v32 }
  0xe0   :  { %415 = vmatpush3.msra.mxu1 %v149_v32 }
  0xe1   :  { %417 = vmatmul.mubr.msk.f32.vlgmr.msra.gmra.mxu1 %vm166_vm3, %v153_v33  ;;  %419 = vmatprep.subr.mxu1 %v458_v2 }
  0xe2   :  { %423 = vmatprep.mubr.msk.f32.mxu1 %vm459_vm1, %v458_v2 }
 0x1a1   :  { %v418_v35 = vpop.f32.mrf.mxu1 }
 0x1a2   :  { %v249_v36 = vadd.f32 %v418_v35, %v164_v34 }
 0x1a3   :  { %v243_v38 = vpop.f32.mrf.mxu1 }
 0x1a4   :  { %v253_v39 = vmax.f32 %v249_v36, 0.0  ;;  %v244_v40 = vadd.f32 %v243_v38, %v159_v37 }
 0x1a6   :  { %v252_v41 = vmax.f32 %v244_v40, 0.0  ;;  %420 = vmatpush3.msk.msra.mxu1 %vm269_vm5, %v253_v39 }
 0x1a7   :  { %421 = vmatprep.subr.mxu1 %v458_v2 }
 0x1a8   :  { %422 = vmatpush3.msra.mxu1 %v252_v41 }
 0x1a9   :  { %424 = vmatmul.mubr.msk.f32.vlgmr.msra.gmra.mxu1 %vm265_vm6, %v254_v42 }
 0x269   :  { %v339_v48 = vpop.f32.mrf.mxu1 }
 0x26a   :  { %v340_v49 = vadd.f32 %v339_v48, %v264_v47 }
 0x26b   :  { %v425_v50 = vpop.f32.mrf.mxu1 }
 0x26c   :  { %v374_v51 = vmul.f32 -1.442695, %v340_v49 }
 0x26e   :  { %432 = vpow2.f32 %v374_v51 }
 0x27b   :  { %v433_v52 = vpop.eup %432 }
 0x27c   :  { %v346_v53 = vadd.f32 1.0, %v433_v52 }
 0x27e   :  { %434 = vrcp.f32 %v346_v53 }
 0x28b   :  { %v435_v54 = vpop.eup %434 }
 0x28c   :  { %350 = vst.msk [vmem:[#allocation3] sm:$0x1] %vm349_vm7, %v435_v54 }
 0x28d   :  { %447 = shalt.err (!%p444_p4)
}
 0x28e   :  { %360 = dma.vmem_to_hbm [thread:$0]  %s358_s5, 16, %s580_s7, [#allocation4]  }
 0x28f   :  { %456 = dma.done.wait [#allocation4], 16  }
 0x290   :  { %457 = vsyncadd [#allocation4], 4294967280 }
 0x291   :  { %364 = vsyncpa [#allocation4], 1 }

</bundles_post_ra>
